<compile_context>
chip_gen: v5e
topology: v5e:2x2
jax: 0.10.0
libtpu: 0.0.40
codegen_flags: <defaults>
</compile_context>

<pallas_src>
import jax
import jax.numpy as jnp
from jax.experimental import pallas as pl
from jax.experimental.pallas import tpu as pltpu

DIM_X = 3          # dim_x
FILTER = 128       # filter_size
LAYER_SIZE = 8     # layer_size -> 1 input linear + 7 hidden linears + 1 out linear


def mlp_kernel(x_ref, w0_ref, b0_ref, wh_ref, bh_ref, wot_ref, bo_ref, o_ref):
    # x_ref: (tm, DIM_X) tile of flattened points.
    x = x_ref[...].astype(jnp.float32)

    # ---- Input layer (K = 3): too thin for the MXU -> 3 VPU broadcast FMAs.
    w0 = w0_ref[...]                      # (3, FILTER) f32
    h = b0_ref[...]                       # (1, FILTER) broadcasts over rows
    h = h + x[:, 0:1] * w0[0:1, :]
    h = h + x[:, 1:2] * w0[1:2, :]
    h = h + x[:, 2:3] * w0[2:3, :]
    h = jnp.maximum(h, 0.0)

    # ---- Hidden layers: bf16 operands on the MXU, f32 accumulate, f32 bias/ReLU.
    # (Python `for` kept unrolled; switch to lax.fori_loop(unroll=True) only if
    #  bundle dumps at large tm show vreg spill traffic.)
    for l in range(LAYER_SIZE - 1):
        h = jnp.dot(h.astype(jnp.bfloat16), wh_ref[l],
                    preferred_element_type=jnp.float32) + bh_ref[l]
        h = jnp.maximum(h, 0.0)

    # ---- Output projection (128 -> 3), no activation.
    # Off the MXU: 3 VPU broadcast-muls + 3 XLU lane reductions (f32 throughout).
    wo_t = wot_ref[...]                   # (DIM_X, FILTER) f32
    cols = [jnp.sum(h * wo_t[j:j + 1, :], axis=-1, keepdims=True)
            for j in range(DIM_X)]
    out = jnp.concatenate(cols, axis=-1) + bo_ref[...]
    o_ref[...] = out.astype(o_ref.dtype)


def init_params(key):
    """Deterministic synthetic parameters (PyTorch Linear-style uniform init)."""
    ks = jax.random.split(key, 6)

    def uni(k, shape, fan_in):
        bound = 1.0 / jnp.sqrt(jnp.float32(fan_in))
        return jax.random.uniform(k, shape, jnp.float32, -bound, bound)

    w0 = uni(ks[0], (DIM_X, FILTER), DIM_X)                      # Linear(3,128).weight^T
    b0 = uni(ks[1], (1, FILTER), DIM_X)                          # Linear(3,128).bias
    wh = uni(ks[2], (LAYER_SIZE - 1, FILTER, FILTER), FILTER)    # 7x Linear(128,128).weight^T
    bh = uni(ks[3], (LAYER_SIZE - 1, 1, FILTER), FILTER)         # 7x Linear(128,128).bias
    wo = uni(ks[4], (FILTER, DIM_X), FILTER)                     # Linear(128,3).weight^T
    bo = uni(ks[5], (1, DIM_X), FILTER)                          # Linear(128,3).bias
    return w0, b0, wh, bh, wo, bo


def _round_up(v, m):
    return ((v + m - 1) // m) * m


def mlp_forward(x, params, tm=2048):
    """x: [B, N, DIM_X] -> [B, N, DIM_X].

    tm: rows per grid step (sweepable, 1024-4096 recommended).  Default 2048
    amortizes the ~0.35 us per-grid-step pipeline overhead while keeping
    VMEM use (~10 MB) well inside v7x's 64 MiB.  For real point clouds
    M // tm >> 2, so the single 'parallel' grid axis also shards across the
    two v7x TensorCores; it is clamped down for tiny inputs.
    """
    B, N, d = x.shape
    assert d == DIM_X

    w0, b0, wh, bh, wo, bo = params
    # Cast the MXU-side (hidden) weights to bf16 once; output weights stay f32
    # because the 128->3 projection now runs on the VPU/XLU.
    wh_bf = wh.astype(jnp.bfloat16)
    wo_t = wo.T                                   # (DIM_X, FILTER) f32

    # Clamp the tile for small inputs, keep it a multiple of 8 (sublane).
    M = B * N
    tm = max(8, min(tm, _round_up(M, 8)))
    assert tm % 8 == 0

    # Pad M up to a multiple of tm (keeps the large tile for arbitrary M).
    grid_m = pl.cdiv(M, tm)
    Mp = grid_m * tm
    xf = x.reshape(M, d)
    if Mp != M:
        xf = jnp.pad(xf, ((0, Mp - M), (0, 0)))

    flops = 2 * Mp * (DIM_X * FILTER
                      + (LAYER_SIZE - 1) * FILTER * FILTER
                      + FILTER * DIM_X)
    bytes_accessed = (Mp * DIM_X * 4 * 2                 # input + output rows
                      + w0.size * 4 + b0.size * 4
                      + wh_bf.size * 2 + bh.size * 4
                      + wo_t.size * 4 + bo.size * 4)
    cost = pl.CostEstimate(flops=flops, transcendentals=0,
                           bytes_accessed=bytes_accessed)

    out = pl.pallas_call(
        mlp_kernel,
        out_shape=jax.ShapeDtypeStruct((Mp, d), x.dtype),
        grid_spec=pltpu.PrefetchScalarGridSpec(
            num_scalar_prefetch=0,
            grid=(grid_m,),
            in_specs=[
                pl.BlockSpec((tm, d), lambda i: (i, 0)),          # x row tile
                pl.BlockSpec(w0.shape, lambda i: (0, 0)),         # weights resident
                pl.BlockSpec(b0.shape, lambda i: (0, 0)),
                pl.BlockSpec(wh_bf.shape, lambda i: (0, 0, 0)),
                pl.BlockSpec(bh.shape, lambda i: (0, 0, 0)),
                pl.BlockSpec(wo_t.shape, lambda i: (0, 0)),
                pl.BlockSpec(bo.shape, lambda i: (0, 0)),
            ],
            out_specs=pl.BlockSpec((tm, d), lambda i: (i, 0)),
        ),
        compiler_params=pltpu.CompilerParams(
            dimension_semantics=("parallel",),
            # Raise the scoped-VMEM budget so the big tile also compiles on
            # v5e (16 MiB default); actual use at tm=2048 is ~10 MB.
            vmem_limit_bytes=48 * 1024 * 1024),
        cost_estimate=cost,
    )(xf, w0, b0, wh_bf, bh, wo_t, bo)

    return out[:M].reshape(B, N, d)


def mlp_reference(x, params):
    """Pure-JAX f32 reference of the PyTorch forward, for validation."""
    w0, b0, wh, bh, wo, bo = params
    B, N, d = x.shape
    h = x.reshape(B * N, d)
    h = jnp.maximum(h @ w0 + b0, 0.0)
    for l in range(LAYER_SIZE - 1):
        h = jnp.maximum(h @ wh[l] + bh[l], 0.0)
    out = h @ wo + bo
    return out.reshape(B, N, d)


if __name__ == "__main__":
    key = jax.random.PRNGKey(0)
    kx, kp = jax.random.split(key)

    B, N = 2, 16                     # small: 32 points of dim 3
    x = jax.random.normal(kx, (B, N, DIM_X), jnp.float32)
    params = init_params(kp)

    out = mlp_forward(x, params)     # tm clamps to 32 rows for this tiny input
    out = jax.block_until_ready(out)

    ref = mlp_reference(x, params)
    assert out.shape == (B, N, DIM_X)
    # bf16 MXU operands with f32 accumulation -> loosened tolerance vs f32 ref.
    assert jnp.allclose(out, ref, atol=2e-2, rtol=2e-2)

    print("KERNEL_OK")
</pallas_src>

<mosaic_0001>
module attributes {stable_mosaic.version = 11 : i64} {
  func.func @mlp_kernel(%arg0: i32, %arg1: memref<32x3xf32, #tpu.memory_space<vmem>>, %arg2: memref<3x128xf32, #tpu.memory_space<vmem>>, %arg3: memref<1x128xf32, #tpu.memory_space<vmem>>, %arg4: memref<7x128x128xbf16, #tpu.memory_space<vmem>>, %arg5: memref<7x1x128xf32, #tpu.memory_space<vmem>>, %arg6: memref<3x128xf32, #tpu.memory_space<vmem>>, %arg7: memref<1x3xf32, #tpu.memory_space<vmem>>, %arg8: memref<32x3xf32, #tpu.memory_space<vmem>>) attributes {dimension_semantics = [#tpu.dimension_semantics<parallel>], iteration_bounds = array<i64: 1>, scalar_prefetch = 0 : i64, scratch_operands = 0 : i64, tpu.core_type = #tpu.core_type<tc>, window_params = [{transform_indices = @transform_0, window_bounds = array<i64: 32, 3>}, {pipeline_mode = #tpu.pipeline_mode<synchronous>, transform_indices = @transform_1, window_bounds = array<i64: 3, 128>}, {pipeline_mode = #tpu.pipeline_mode<synchronous>, transform_indices = @transform_2, window_bounds = array<i64: 1, 128>}, {pipeline_mode = #tpu.pipeline_mode<synchronous>, transform_indices = @transform_3, window_bounds = array<i64: 7, 128, 128>}, {pipeline_mode = #tpu.pipeline_mode<synchronous>, transform_indices = @transform_4, window_bounds = array<i64: 7, 1, 128>}, {pipeline_mode = #tpu.pipeline_mode<synchronous>, transform_indices = @transform_5, window_bounds = array<i64: 3, 128>}, {pipeline_mode = #tpu.pipeline_mode<synchronous>, transform_indices = @transform_6, window_bounds = array<i64: 1, 3>}, {transform_indices = @transform_7, window_bounds = array<i64: 32, 3>}]} {
    %c0 = arith.constant 0 : index
    %c0_0 = arith.constant 0 : index
    %0 = vector.load %arg1[%c0, %c0_0] : memref<32x3xf32, #tpu.memory_space<vmem>>, vector<32x3xf32>
    %c0_1 = arith.constant 0 : index
    %c0_2 = arith.constant 0 : index
    %1 = vector.load %arg2[%c0_1, %c0_2] : memref<3x128xf32, #tpu.memory_space<vmem>>, vector<3x128xf32>
    %c0_3 = arith.constant 0 : index
    %c0_4 = arith.constant 0 : index
    %2 = vector.load %arg3[%c0_3, %c0_4] : memref<1x128xf32, #tpu.memory_space<vmem>>, vector<1x128xf32>
    %3 = vector.extract_strided_slice %0 {offsets = [0, 0], sizes = [32, 1], strides = [1, 1]} : vector<32x3xf32> to vector<32x1xf32>
    %4 = vector.extract_strided_slice %1 {offsets = [0, 0], sizes = [1, 128], strides = [1, 1]} : vector<3x128xf32> to vector<1x128xf32>
    %5 = vector.broadcast %3 : vector<32x1xf32> to vector<32x128xf32>
    %6 = vector.broadcast %4 : vector<1x128xf32> to vector<32x128xf32>
    %7 = arith.mulf %5, %6 : vector<32x128xf32>
    %8 = vector.broadcast %2 : vector<1x128xf32> to vector<32x128xf32>
    %9 = arith.addf %8, %7 : vector<32x128xf32>
    %10 = vector.extract_strided_slice %0 {offsets = [0, 1], sizes = [32, 1], strides = [1, 1]} : vector<32x3xf32> to vector<32x1xf32>
    %11 = vector.extract_strided_slice %1 {offsets = [1, 0], sizes = [1, 128], strides = [1, 1]} : vector<3x128xf32> to vector<1x128xf32>
    %12 = vector.broadcast %10 : vector<32x1xf32> to vector<32x128xf32>
    %13 = vector.broadcast %11 : vector<1x128xf32> to vector<32x128xf32>
    %14 = arith.mulf %12, %13 : vector<32x128xf32>
    %15 = arith.addf %9, %14 : vector<32x128xf32>
    %16 = vector.extract_strided_slice %0 {offsets = [0, 2], sizes = [32, 1], strides = [1, 1]} : vector<32x3xf32> to vector<32x1xf32>
    %17 = vector.extract_strided_slice %1 {offsets = [2, 0], sizes = [1, 128], strides = [1, 1]} : vector<3x128xf32> to vector<1x128xf32>
    %18 = vector.broadcast %16 : vector<32x1xf32> to vector<32x128xf32>
    %19 = vector.broadcast %17 : vector<1x128xf32> to vector<32x128xf32>
    %20 = arith.mulf %18, %19 : vector<32x128xf32>
    %21 = arith.addf %15, %20 : vector<32x128xf32>
    %cst = arith.constant 0.000000e+00 : f32
    %22 = vector.broadcast %cst : f32 to vector<32x128xf32>
    %23 = arith.maximumf %21, %22 : vector<32x128xf32>
    %24 = arith.truncf %23 : vector<32x128xf32> to vector<32x128xbf16>
    %c0_5 = arith.constant 0 : index
    %c0_6 = arith.constant 0 : index
    %c0_7 = arith.constant 0 : index
    %25 = vector.load %arg4[%c0_5, %c0_6, %c0_7] : memref<7x128x128xbf16, #tpu.memory_space<vmem>>, vector<1x128x128xbf16>
    %26 = vector.shape_cast %25 : vector<1x128x128xbf16> to vector<128x128xbf16>
    %cst_8 = arith.constant dense<0.000000e+00> : vector<32x128xf32>
    %27 = tpu.matmul %24, %26, %cst_8 {dimension_numbers = #tpu.dot_dimension_numbers<[1], [0], [0], [1], [0, 0, 1, 1], [], []>} : vector<32x128xbf16>, vector<128x128xbf16>, vector<32x128xf32> -> vector<32x128xf32>
    %c0_9 = arith.constant 0 : index
    %c0_10 = arith.constant 0 : index
    %c0_11 = arith.constant 0 : index
    %28 = vector.load %arg5[%c0_9, %c0_10, %c0_11] : memref<7x1x128xf32, #tpu.memory_space<vmem>>, vector<1x1x128xf32>
    %29 = vector.shape_cast %28 : vector<1x1x128xf32> to vector<1x128xf32>
    %30 = vector.broadcast %29 : vector<1x128xf32> to vector<32x128xf32>
    %31 = arith.addf %27, %30 : vector<32x128xf32>
    %cst_12 = arith.constant 0.000000e+00 : f32
    %32 = vector.broadcast %cst_12 : f32 to vector<32x128xf32>
    %33 = arith.maximumf %31, %32 : vector<32x128xf32>
    %34 = arith.truncf %33 : vector<32x128xf32> to vector<32x128xbf16>
    %c1 = arith.constant 1 : index
    %c0_13 = arith.constant 0 : index
    %c0_14 = arith.constant 0 : index
    %35 = vector.load %arg4[%c1, %c0_13, %c0_14] : memref<7x128x128xbf16, #tpu.memory_space<vmem>>, vector<1x128x128xbf16>
    %36 = vector.shape_cast %35 : vector<1x128x128xbf16> to vector<128x128xbf16>
    %cst_15 = arith.constant dense<0.000000e+00> : vector<32x128xf32>
    %37 = tpu.matmul %34, %36, %cst_15 {dimension_numbers = #tpu.dot_dimension_numbers<[1], [0], [0], [1], [0, 0, 1, 1], [], []>} : vector<32x128xbf16>, vector<128x128xbf16>, vector<32x128xf32> -> vector<32x128xf32>
    %c1_16 = arith.constant 1 : index
    %c0_17 = arith.constant 0 : index
    %c0_18 = arith.constant 0 : index
    %38 = vector.load %arg5[%c1_16, %c0_17, %c0_18] : memref<7x1x128xf32, #tpu.memory_space<vmem>>, vector<1x1x128xf32>
    %39 = vector.shape_cast %38 : vector<1x1x128xf32> to vector<1x128xf32>
    %40 = vector.broadcast %39 : vector<1x128xf32> to vector<32x128xf32>
    %41 = arith.addf %37, %40 : vector<32x128xf32>
    %cst_19 = arith.constant 0.000000e+00 : f32
    %42 = vector.broadcast %cst_19 : f32 to vector<32x128xf32>
    %43 = arith.maximumf %41, %42 : vector<32x128xf32>
    %44 = arith.truncf %43 : vector<32x128xf32> to vector<32x128xbf16>
    %c2 = arith.constant 2 : index
    %c0_20 = arith.constant 0 : index
    %c0_21 = arith.constant 0 : index
    %45 = vector.load %arg4[%c2, %c0_20, %c0_21] : memref<7x128x128xbf16, #tpu.memory_space<vmem>>, vector<1x128x128xbf16>
    %46 = vector.shape_cast %45 : vector<1x128x128xbf16> to vector<128x128xbf16>
    %cst_22 = arith.constant dense<0.000000e+00> : vector<32x128xf32>
    %47 = tpu.matmul %44, %46, %cst_22 {dimension_numbers = #tpu.dot_dimension_numbers<[1], [0], [0], [1], [0, 0, 1, 1], [], []>} : vector<32x128xbf16>, vector<128x128xbf16>, vector<32x128xf32> -> vector<32x128xf32>
    %c2_23 = arith.constant 2 : index
    %c0_24 = arith.constant 0 : index
    %c0_25 = arith.constant 0 : index
    %48 = vector.load %arg5[%c2_23, %c0_24, %c0_25] : memref<7x1x128xf32, #tpu.memory_space<vmem>>, vector<1x1x128xf32>
    %49 = vector.shape_cast %48 : vector<1x1x128xf32> to vector<1x128xf32>
    %50 = vector.broadcast %49 : vector<1x128xf32> to vector<32x128xf32>
    %51 = arith.addf %47, %50 : vector<32x128xf32>
    %cst_26 = arith.constant 0.000000e+00 : f32
    %52 = vector.broadcast %cst_26 : f32 to vector<32x128xf32>
    %53 = arith.maximumf %51, %52 : vector<32x128xf32>
    %54 = arith.truncf %53 : vector<32x128xf32> to vector<32x128xbf16>
    %c3 = arith.constant 3 : index
    %c0_27 = arith.constant 0 : index
    %c0_28 = arith.constant 0 : index
    %55 = vector.load %arg4[%c3, %c0_27, %c0_28] : memref<7x128x128xbf16, #tpu.memory_space<vmem>>, vector<1x128x128xbf16>
    %56 = vector.shape_cast %55 : vector<1x128x128xbf16> to vector<128x128xbf16>
    %cst_29 = arith.constant dense<0.000000e+00> : vector<32x128xf32>
    %57 = tpu.matmul %54, %56, %cst_29 {dimension_numbers = #tpu.dot_dimension_numbers<[1], [0], [0], [1], [0, 0, 1, 1], [], []>} : vector<32x128xbf16>, vector<128x128xbf16>, vector<32x128xf32> -> vector<32x128xf32>
    %c3_30 = arith.constant 3 : index
    %c0_31 = arith.constant 0 : index
    %c0_32 = arith.constant 0 : index
    %58 = vector.load %arg5[%c3_30, %c0_31, %c0_32] : memref<7x1x128xf32, #tpu.memory_space<vmem>>, vector<1x1x128xf32>
    %59 = vector.shape_cast %58 : vector<1x1x128xf32> to vector<1x128xf32>
    %60 = vector.broadcast %59 : vector<1x128xf32> to vector<32x128xf32>
    %61 = arith.addf %57, %60 : vector<32x128xf32>
    %cst_33 = arith.constant 0.000000e+00 : f32
    %62 = vector.broadcast %cst_33 : f32 to vector<32x128xf32>
    %63 = arith.maximumf %61, %62 : vector<32x128xf32>
    %64 = arith.truncf %63 : vector<32x128xf32> to vector<32x128xbf16>
    %c4 = arith.constant 4 : index
    %c0_34 = arith.constant 0 : index
    %c0_35 = arith.constant 0 : index
    %65 = vector.load %arg4[%c4, %c0_34, %c0_35] : memref<7x128x128xbf16, #tpu.memory_space<vmem>>, vector<1x128x128xbf16>
    %66 = vector.shape_cast %65 : vector<1x128x128xbf16> to vector<128x128xbf16>
    %cst_36 = arith.constant dense<0.000000e+00> : vector<32x128xf32>
    %67 = tpu.matmul %64, %66, %cst_36 {dimension_numbers = #tpu.dot_dimension_numbers<[1], [0], [0], [1], [0, 0, 1, 1], [], []>} : vector<32x128xbf16>, vector<128x128xbf16>, vector<32x128xf32> -> vector<32x128xf32>
    %c4_37 = arith.constant 4 : index
    %c0_38 = arith.constant 0 : index
    %c0_39 = arith.constant 0 : index
    %68 = vector.load %arg5[%c4_37, %c0_38, %c0_39] : memref<7x1x128xf32, #tpu.memory_space<vmem>>, vector<1x1x128xf32>
    %69 = vector.shape_cast %68 : vector<1x1x128xf32> to vector<1x128xf32>
    %70 = vector.broadcast %69 : vector<1x128xf32> to vector<32x128xf32>
    %71 = arith.addf %67, %70 : vector<32x128xf32>
    %cst_40 = arith.constant 0.000000e+00 : f32
    %72 = vector.broadcast %cst_40 : f32 to vector<32x128xf32>
    %73 = arith.maximumf %71, %72 : vector<32x128xf32>
    %74 = arith.truncf %73 : vector<32x128xf32> to vector<32x128xbf16>
    %c5 = arith.constant 5 : index
    %c0_41 = arith.constant 0 : index
    %c0_42 = arith.constant 0 : index
    %75 = vector.load %arg4[%c5, %c0_41, %c0_42] : memref<7x128x128xbf16, #tpu.memory_space<vmem>>, vector<1x128x128xbf16>
    %76 = vector.shape_cast %75 : vector<1x128x128xbf16> to vector<128x128xbf16>
    %cst_43 = arith.constant dense<0.000000e+00> : vector<32x128xf32>
    %77 = tpu.matmul %74, %76, %cst_43 {dimension_numbers = #tpu.dot_dimension_numbers<[1], [0], [0], [1], [0, 0, 1, 1], [], []>} : vector<32x128xbf16>, vector<128x128xbf16>, vector<32x128xf32> -> vector<32x128xf32>
    %c5_44 = arith.constant 5 : index
    %c0_45 = arith.constant 0 : index
    %c0_46 = arith.constant 0 : index
    %78 = vector.load %arg5[%c5_44, %c0_45, %c0_46] : memref<7x1x128xf32, #tpu.memory_space<vmem>>, vector<1x1x128xf32>
    %79 = vector.shape_cast %78 : vector<1x1x128xf32> to vector<1x128xf32>
    %80 = vector.broadcast %79 : vector<1x128xf32> to vector<32x128xf32>
    %81 = arith.addf %77, %80 : vector<32x128xf32>
    %cst_47 = arith.constant 0.000000e+00 : f32
    %82 = vector.broadcast %cst_47 : f32 to vector<32x128xf32>
    %83 = arith.maximumf %81, %82 : vector<32x128xf32>
    %84 = arith.truncf %83 : vector<32x128xf32> to vector<32x128xbf16>
    %c6 = arith.constant 6 : index
    %c0_48 = arith.constant 0 : index
    %c0_49 = arith.constant 0 : index
    %85 = vector.load %arg4[%c6, %c0_48, %c0_49] : memref<7x128x128xbf16, #tpu.memory_space<vmem>>, vector<1x128x128xbf16>
    %86 = vector.shape_cast %85 : vector<1x128x128xbf16> to vector<128x128xbf16>
    %cst_50 = arith.constant dense<0.000000e+00> : vector<32x128xf32>
    %87 = tpu.matmul %84, %86, %cst_50 {dimension_numbers = #tpu.dot_dimension_numbers<[1], [0], [0], [1], [0, 0, 1, 1], [], []>} : vector<32x128xbf16>, vector<128x128xbf16>, vector<32x128xf32> -> vector<32x128xf32>
    %c6_51 = arith.constant 6 : index
    %c0_52 = arith.constant 0 : index
    %c0_53 = arith.constant 0 : index
    %88 = vector.load %arg5[%c6_51, %c0_52, %c0_53] : memref<7x1x128xf32, #tpu.memory_space<vmem>>, vector<1x1x128xf32>
    %89 = vector.shape_cast %88 : vector<1x1x128xf32> to vector<1x128xf32>
    %90 = vector.broadcast %89 : vector<1x128xf32> to vector<32x128xf32>
    %91 = arith.addf %87, %90 : vector<32x128xf32>
    %cst_54 = arith.constant 0.000000e+00 : f32
    %92 = vector.broadcast %cst_54 : f32 to vector<32x128xf32>
    %93 = arith.maximumf %91, %92 : vector<32x128xf32>
    %c0_55 = arith.constant 0 : index
    %c0_56 = arith.constant 0 : index
    %94 = vector.load %arg6[%c0_55, %c0_56] : memref<3x128xf32, #tpu.memory_space<vmem>>, vector<3x128xf32>
    %95 = vector.extract_strided_slice %94 {offsets = [0, 0], sizes = [1, 128], strides = [1, 1]} : vector<3x128xf32> to vector<1x128xf32>
    %96 = vector.broadcast %95 : vector<1x128xf32> to vector<32x128xf32>
    %97 = arith.mulf %93, %96 : vector<32x128xf32>
    %cst_57 = arith.constant dense<0.000000e+00> : vector<32xf32>
    %98 = vector.multi_reduction <add>, %97, %cst_57 [1] : vector<32x128xf32> to vector<32xf32>
    %99 = vector.shape_cast %98 : vector<32xf32> to vector<32x1xf32>
    %100 = vector.extract_strided_slice %94 {offsets = [1, 0], sizes = [1, 128], strides = [1, 1]} : vector<3x128xf32> to vector<1x128xf32>
    %101 = vector.broadcast %100 : vector<1x128xf32> to vector<32x128xf32>
    %102 = arith.mulf %93, %101 : vector<32x128xf32>
    %cst_58 = arith.constant dense<0.000000e+00> : vector<32xf32>
    %103 = vector.multi_reduction <add>, %102, %cst_58 [1] : vector<32x128xf32> to vector<32xf32>
    %104 = vector.shape_cast %103 : vector<32xf32> to vector<32x1xf32>
    %105 = vector.extract_strided_slice %94 {offsets = [2, 0], sizes = [1, 128], strides = [1, 1]} : vector<3x128xf32> to vector<1x128xf32>
    %106 = vector.broadcast %105 : vector<1x128xf32> to vector<32x128xf32>
    %107 = arith.mulf %93, %106 : vector<32x128xf32>
    %cst_59 = arith.constant dense<0.000000e+00> : vector<32xf32>
    %108 = vector.multi_reduction <add>, %107, %cst_59 [1] : vector<32x128xf32> to vector<32xf32>
    %109 = vector.shape_cast %108 : vector<32xf32> to vector<32x1xf32>
    %110 = tpu.concatenate %99, %104, %109 in 1 : vector<32x1xf32>, vector<32x1xf32>, vector<32x1xf32> -> vector<32x3xf32>
    %c0_60 = arith.constant 0 : index
    %c0_61 = arith.constant 0 : index
    %111 = vector.load %arg7[%c0_60, %c0_61] : memref<1x3xf32, #tpu.memory_space<vmem>>, vector<1x3xf32>
    %112 = vector.broadcast %111 : vector<1x3xf32> to vector<32x3xf32>
    %113 = arith.addf %110, %112 : vector<32x3xf32>
    %c0_62 = arith.constant 0 : index
    %c0_63 = arith.constant 0 : index
    %114 = vector.load %arg8[%c0_62, %c0_63] : memref<32x3xf32, #tpu.memory_space<vmem>>, vector<32x3xf32>
    tpu.vector_store %arg8[%c0_62, %c0_63], %113 {strides = array<i32>} : memref<32x3xf32, #tpu.memory_space<vmem>>, vector<32x3xf32>,
    return
  }
  func.func @transform_0(%arg0: i32) -> (i32, i32) {
    %c0_i32 = arith.constant 0 : i32
    %c0_i32_0 = arith.constant 0 : i32
    return %arg0, %c0_i32 : i32, i32
  }
  func.func @transform_1(%arg0: i32) -> (i32, i32) {
    %c0_i32 = arith.constant 0 : i32
    %c0_i32_0 = arith.constant 0 : i32
    %c0_i32_1 = arith.constant 0 : i32
    return %c0_i32, %c0_i32_0 : i32, i32
  }
  func.func @transform_2(%arg0: i32) -> (i32, i32) {
    %c0_i32 = arith.constant 0 : i32
    %c0_i32_0 = arith.constant 0 : i32
    %c0_i32_1 = arith.constant 0 : i32
    return %c0_i32, %c0_i32_0 : i32, i32
  }
  func.func @transform_3(%arg0: i32) -> (i32, i32, i32) {
    %c0_i32 = arith.constant 0 : i32
    %c0_i32_0 = arith.constant 0 : i32
    %c0_i32_1 = arith.constant 0 : i32
    %c0_i32_2 = arith.constant 0 : i32
    return %c0_i32, %c0_i32_0, %c0_i32_1 : i32, i32, i32
  }
  func.func @transform_4(%arg0: i32) -> (i32, i32, i32) {
    %c0_i32 = arith.constant 0 : i32
    %c0_i32_0 = arith.constant 0 : i32
    %c0_i32_1 = arith.constant 0 : i32
    %c0_i32_2 = arith.constant 0 : i32
    return %c0_i32, %c0_i32_0, %c0_i32_1 : i32, i32, i32
  }
  func.func @transform_5(%arg0: i32) -> (i32, i32) {
    %c0_i32 = arith.constant 0 : i32
    %c0_i32_0 = arith.constant 0 : i32
    %c0_i32_1 = arith.constant 0 : i32
    return %c0_i32, %c0_i32_0 : i32, i32
  }
  func.func @transform_6(%arg0: i32) -> (i32, i32) {
    %c0_i32 = arith.constant 0 : i32
    %c0_i32_0 = arith.constant 0 : i32
    %c0_i32_1 = arith.constant 0 : i32
    return %c0_i32, %c0_i32_0 : i32, i32
  }
  func.func @transform_7(%arg0: i32) -> (i32, i32) {
    %c0_i32 = arith.constant 0 : i32
    %c0_i32_0 = arith.constant 0 : i32
    return %arg0, %c0_i32 : i32, i32
  }
}

</mosaic_0001>

<bundles_post_ra>
// kernel: tpu_custom_call.1
= control target key start
LH: loop header
LB: loop body
LE: loop exit
PB: predicated region body
PF: predicated region fallthrough
CT: control target
= control target key end

     0   :  { %12 = vsyncpa [#allocation3], 0  ;;  %s1209_s27 = smov [#allocation2]   ;;  %s1210_s29 = smov 64   ;;  %s1327_s0 = inlined_call_operand.vmem [shape: f32[32,3], index: 0, kind: input, shape index: {}]   ;;  %s1328_s1 = inlined_call_operand.vmem [shape: f32[3,128], index: 1, kind: input, shape index: {}]   ;;  %s1329_s2 = inlined_call_operand.vmem [shape: f32[1,128], index: 2, kind: input, shape index: {}]   ;;  %s1330_s3 = inlined_call_operand.hbm [shape: bf16[7,128,128], index: 3, kind: input, shape index: {}]   ;;  %s1331_s4 = inlined_call_operand.vmem [shape: f32[7,1,128], index: 4, kind: input, shape index: {}]   ;;  %s1332_s5 = inlined_call_operand.vmem [shape: f32[3,128], index: 5, kind: input, shape index: {}]   ;;  %s1333_s6 = inlined_call_operand.vmem [shape: f32[1,3], index: 6, kind: input, shape index: {}]   ;;  %s1334_s7 = inlined_call_operand.vmem [shape: f32[32,3], index: 7, kind: output, shape index: {}]  }
   0x1   :  { %s23_s26 = sshll.u32 %s1330_s3, 4  ;;  %s25_s28 = sshll.u32 %s1209_s27, 4  ;;  %s24_s26 = int_to_ptr.hbm [resolvable:$true] %s23_s26  ;;  %s26_s28 = int_to_ptr.vmem [resolvable:$true] %s25_s28 }
   0x2   :  { %s1211_s30 = smov 4  }
   0x3   :  { %31 = dma.hbm_to_vmem [thread:$0]  %s24_s26, 7168, %s26_s28, [#allocation3], %s1210_s29, %s1210_s29, %s1211_s30  }
   0x4   :  { %1207 = dma.done.wait [#allocation3], 7168  }
   0x5   :  { %1208 = vsyncadd [#allocation3], 4294960128  ;;  %v1212_v0 = vmov 1   ;;  %v1213_v1 = vmov 0   ;;  %v1214_v2 = vmov 2   ;;  %v42_v3 = vld [vmem:[%s1327_s0] sm:$0xff] }
   0x6   :  { %1166 = vset.pattern.permute.xlu1 %v1212_v0  ;;  %1165 = vset.pattern.permute.xlu0 %v1213_v1  ;;  %v1102_v4 = vld [vmem:[#allocation2 + $0x38] sm:$0xff]  ;;  %v1101_v5 = vld [vmem:[#allocation2 + $0x30] sm:$0xff]  ;;  %v43_v6 = vld [vmem:[%s1327_s0 + $0x8] sm:$0xff]  ;;  %vm837_vm0 = vcmask 7168   ;;  %vm842_vm1 = vcmask 15360   ;;  %vm855_vm2 = vcmask 23552  }
   0x7   :  { %1167 = vset.pattern.permute.xlu2 %v1214_v2  ;;  %81 = vperm.xlu1 %1166, %v42_v3   ;;  %v44_v7 = vld [vmem:[%s1327_s0 + $0x10] sm:$0xff]  ;;  %v45_v8 = vld [vmem:[%s1327_s0 + $0x18] sm:$0xff]  ;;  %v1100_v9 = vld [vmem:[#allocation2 + $0x28] sm:$0xff] }
   0x8   :  { %50 = vperm.xlu0 %1165, %v42_v3   ;;  %106 = vperm.xlu2 %1167, %v42_v3   ;;  %v1099_v10 = vld [vmem:[#allocation2 + $0x20] sm:$0xff]  ;;  %v1098_v11 = vld [vmem:[#allocation2 + $0x18] sm:$0xff]  ;;  %v1097_v12 = vld [vmem:[#allocation2 + $0x10] sm:$0xff] }
   0x9   :  { %204 = vmatpush.bf16.msra.mxu0 %v1102_v4  ;;  %v1096_v13 = vld [vmem:[#allocation2 + $0x8] sm:$0xff]  ;;  %v1095_v14 = vld [vmem:[#allocation2] sm:$0xff]  ;;  %v1110_v26 = vld [vmem:[#allocation2 + $0x78] sm:$0xff] }
   0xa   :  { %v46_v15 = vld [vmem:[%s1328_s1] sm:$0x7]  ;;  %299 = vmatpush.bf16.msra.mxu1 %v1110_v26  ;;  %v1109_v28 = vld [vmem:[#allocation2 + $0x70] sm:$0xff]  ;;  %v1108_v36 = vld [vmem:[#allocation2 + $0x68] sm:$0xff] }
   0xb   :  { %v68_v17 = vperm.slane %v46_v15, 0  ;;  %v96_v20 = vperm.slane %v46_v15, 1  ;;  %v1174_v21 = vld [vmem:[%s1329_s2] ss:$0 sm:$0xff]  ;;  %v121_v27 = vperm.slane %v46_v15, 2  ;;  %v1105_v3 = vld [vmem:[#allocation2 + $0x50] sm:$0xff] }
   0xc   :  { %v1107_v42 = vld [vmem:[#allocation2 + $0x60] sm:$0xff]  ;;  %v1104_v4 = vld [vmem:[#allocation2 + $0x48] sm:$0xff]  ;;  %v1113_v26 = vld [vmem:[#allocation2 + $0x90] sm:$0xff] }
   0xd   :  { %205 = vmatpush.bf16.msra.mxu0 %v1101_v5  ;;  %v1103_v5 = vld [vmem:[#allocation2 + $0x40] sm:$0xff] }
   0xe   :  { %300 = vmatpush.bf16.msra.mxu1 %v1109_v28  ;;  %v1111_v28 = vld [vmem:[#allocation2 + $0x80] sm:$0xff] }
   0xf   :  { %85 = vperm.xlu1 %1166, %v43_v6  }
  0x10   :  { %55 = vperm.xlu0 %1165, %v43_v6   ;;  %110 = vperm.xlu2 %1167, %v43_v6   ;;  %v1118_v6 = vld [vmem:[#allocation2 + $0xb8] sm:$0xff] }
  0x11   :  { %206 = vmatpush.bf16.msra.mxu0 %v1100_v9  ;;  %394 = vmatpush.bf16.msra.mxu2 %v1118_v6  ;;  %v1175_v9 = vld [vmem:[%s1331_s4] ss:$0 sm:$0xff] }
  0x12   :  { %301 = vmatpush.bf16.msra.mxu1 %v1108_v36 }
  0x15   :  { %207 = vmatpush.bf16.msra.mxu0 %v1099_v10  ;;  %v1116_v10 = vld [vmem:[#allocation2 + $0xa8] sm:$0xff] }
  0x16   :  { %302 = vmatpush.bf16.msra.mxu1 %v1107_v42 }
  0x17   :  { %1168 = vset.pattern.permute.xlu1 %v1213_v1 }
  0x18   :  { %60 = vperm.xlu0 %1165, %v44_v7   ;;  %65 = vperm.xlu1 %1168, %v45_v8  }
  0x19   :  { %1169 = vset.pattern.permute.xlu2 %v1212_v0  ;;  %208 = vmatpush.bf16.msra.mxu0 %v1098_v11 }
  0x1a   :  { %89 = vperm.xlu2 %1169, %v44_v7  }
  0x1d   :  { %209 = vmatpush.bf16.msra.mxu0 %v1097_v12 }
  0x20   :  { %1170 = vset.pattern.permute.xlu0 %v1212_v0  ;;  %1171 = vset.pattern.permute.xlu1 %v1214_v2 }
  0x21   :  { %93 = vperm.xlu0 %1170, %v45_v8   ;;  %114 = vperm.xlu1 %1171, %v44_v7  }
  0x22   :  { %1172 = vset.pattern.permute.xlu2 %v1214_v2  ;;  %210 = vmatpush.bf16.msra.mxu0 %v1096_v13 }
  0x23   :  { %118 = vperm.xlu2 %1172, %v45_v8   ;;  %v1117_v8 = vld [vmem:[#allocation2 + $0xb0] sm:$0xff] }
  0x24   :  { %395 = vmatpush.bf16.msra.mxu2 %v1117_v8  ;;  %v1129_v8 = vld [vmem:[#allocation2 + $0x110] sm:$0xff] }
  0x26   :  { %211 = vmatpush.bf16.msra.mxu0 %v1095_v14  ;;  %v1115_v14 = vld [vmem:[#allocation2 + $0xa0] sm:$0xff] }
  0x28   :  { %396 = vmatpush.bf16.msra.mxu2 %v1116_v10  ;;  %v1127_v10 = vld [vmem:[#allocation2 + $0x100] sm:$0xff] }
  0x29   :  { %1173 = vset.pattern.permute.xlu0 %v1214_v2  ;;  %v1106_v2 = vld [vmem:[#allocation2 + $0x58] sm:$0xff] }
  0x2a   :  { %303 = vmatpush.bf16.msra.mxu1 %v1106_v2 }
  0x2c   :  { %397 = vmatpush.bf16.msra.mxu2 %v1115_v14  ;;  %v1178_v14 = vld [vmem:[%s1331_s4 + $0x3] ss:$0 sm:$0xff] }
  0x2e   :  { %304 = vmatpush.bf16.msra.mxu1 %v1105_v3 }
  0x32   :  { %305 = vmatpush.bf16.msra.mxu1 %v1104_v4 }
  0x36   :  { %306 = vmatpush.bf16.msra.mxu1 %v1103_v5 }
  0x62   :  { %v107_v16 = vpop.permute.xlu2 %106 }
  0x63   :  { %v122_v33 = vmul.f32 %v121_v27, %v107_v16 }
  0x6a   :  { %v111_v25 = vpop.permute.xlu2 %110 }
  0x6b   :  { %v123_v37 = vmul.f32 %v121_v27, %v111_v25  ;;  %v1114_v25 = vld [vmem:[#allocation2 + $0x98] sm:$0xff] }
  0x6c   :  { %398 = vmatpush.bf16.msra.mxu2 %v1114_v25 }
  0x70   :  { %399 = vmatpush.bf16.msra.mxu2 %v1113_v26 }
  0x74   :  { %v90_v39 = vpop.permute.xlu2 %89 }
  0x75   :  { %v99_v51 = vmul.f32 %v96_v20, %v90_v39 }
  0x79   :  { %v82_v18 = vpop.permute.xlu1 %81 }
  0x7a   :  { %v51_v19 = vpop.permute.xlu0 %50  ;;  %v97_v23 = vmul.f32 %v96_v20, %v82_v18 }
  0x7b   :  { %v69_v22 = vmul.f32 %v68_v17, %v51_v19 }
  0x7d   :  { %v76_v24 = vadd.f32 %v1174_v21, %v69_v22  ;;  %v119_v52 = vpop.permute.xlu2 %118 }
  0x7e   :  { %v125_v57 = vmul.f32 %v121_v27, %v119_v52  ;;  %v1134_v52 = vld [vmem:[#allocation2 + $0x138] sm:$0xff] }
  0x7f   :  { %v101_v31 = vadd.f32 %v97_v23, %v76_v24  ;;  %584 = vmatpush.bf16.msrb.mxu0 %v1134_v52 }
  0x81   :  { %v86_v29 = vpop.permute.xlu1 %85  ;;  %v126_v40 = vadd.f32 %v122_v33, %v101_v31  ;;  %v1125_v31 = vld [vmem:[#allocation2 + $0xf0] sm:$0xff]  ;;  %v1124_v33 = vld [vmem:[#allocation2 + $0xe8] sm:$0xff] }
  0x82   :  { %v56_v30 = vpop.permute.xlu0 %55  ;;  %v98_v34 = vmul.f32 %v96_v20, %v86_v29  ;;  %v1126_v29 = vld [vmem:[#allocation2 + $0xf8] sm:$0xff] }
  0x83   :  { %v70_v32 = vmul.f32 %v68_v17, %v56_v30  ;;  %v130_v45 = vmax.f32 %v126_v40, 0.0  ;;  %489 = vmatpush.bf16.msra.mxu3 %v1126_v29 }
  0x85   :  { %v77_v35 = vadd.f32 %v1174_v21, %v70_v32  ;;  %v1176_v32 = vld [vmem:[%s1331_s4 + $0x1] ss:$0 sm:$0xff] }
  0x87   :  { %v102_v38 = vadd.f32 %v98_v34, %v77_v35  ;;  %490 = vmatpush.bf16.msra.mxu3 %v1125_v31  ;;  %v1137_v31 = vld [vmem:[#allocation2 + $0x150] sm:$0xff] }
  0x89   :  { %v127_v41 = vadd.f32 %v123_v37, %v102_v38  ;;  %v1123_v37 = vld [vmem:[#allocation2 + $0xe0] sm:$0xff] }
  0x8a   :  { %v61_v43 = vpop.permute.xlu0 %60  ;;  %v66_v44 = vpop.permute.xlu1 %65 }
  0x8b   :  { %v131_v46 = vmax.f32 %v127_v41, 0.0  ;;  %v71_v47 = vmul.f32 %v68_v17, %v61_v43  ;;  %v72_v49 = vmul.f32 %v68_v17, %v66_v44  ;;  %491 = vmatpush.bf16.msra.mxu3 %v1124_v33  ;;  %v1135_v33 = vld [vmem:[#allocation2 + $0x140] sm:$0xff] }
  0x8d   :  { %v134_v48 = vpack.c.bf16 %v131_v46, %v130_v45  ;;  %v78_v50 = vadd.f32 %v1174_v21, %v71_v47  ;;  %v79_v54 = vadd.f32 %v1174_v21, %v72_v49  ;;  %v1121_v49 = vld [vmem:[#allocation2 + $0xd0] sm:$0xff] }
  0x8f   :  { %212 = vmatmul.bf16.vlgmr.msra.gmra.mxu0 %v134_v48  ;;  %v103_v58 = vadd.f32 %v99_v51, %v78_v50  ;;  %492 = vmatpush.bf16.msra.mxu3 %v1123_v37  ;;  %v1122_v48 = vld [vmem:[#allocation2 + $0xd8] sm:$0xff]  ;;  %v1120_v50 = vld [vmem:[#allocation2 + $0xc8] sm:$0xff]  ;;  %v1119_v51 = vld [vmem:[#allocation2 + $0xc0] sm:$0xff] }
  0x93   :  { %v94_v53 = vpop.permute.xlu0 %93  ;;  %v115_v56 = vpop.permute.xlu1 %114  ;;  %493 = vmatpush.bf16.msra.mxu3 %v1122_v48 }
  0x94   :  { %v100_v55 = vmul.f32 %v96_v20, %v94_v53  ;;  %v124_v59 = vmul.f32 %v121_v27, %v115_v56  ;;  %v1112_v27 = vld [vmem:[#allocation2 + $0x88] sm:$0xff] }
  0x95   :  { %400 = vmatpush.bf16.msra.mxu2 %v1112_v27  ;;  %v1132_v56 = vld [vmem:[#allocation2 + $0x128] sm:$0xff] }
  0x96   :  { %v104_v60 = vadd.f32 %v100_v55, %v79_v54  ;;  %v128_v61 = vadd.f32 %v124_v59, %v103_v58  ;;  %v1133_v54 = vld [vmem:[#allocation2 + $0x130] sm:$0xff]  ;;  %v1177_v55 = vld [vmem:[%s1331_s4 + $0x2] ss:$0 sm:$0xff] }
  0x97   :  { %494 = vmatpush.bf16.msra.mxu3 %v1121_v49  ;;  %585 = vmatpush.bf16.msrb.mxu0 %v1133_v54 }
  0x98   :  { %v129_v62 = vadd.f32 %v125_v57, %v104_v60  ;;  %v132_v63 = vmax.f32 %v128_v61, 0.0  ;;  %v1131_v60 = vld [vmem:[#allocation2 + $0x120] sm:$0xff] }
  0x99   :  { %401 = vmatpush.bf16.msra.mxu2 %v1111_v28 }
  0x9a   :  { %v133_v0 = vmax.f32 %v129_v62, 0.0 }
  0x9b   :  { %495 = vmatpush.bf16.msra.mxu3 %v1120_v50  ;;  %586 = vmatpush.bf16.msrb.mxu0 %v1132_v56 }
  0x9c   :  { %v135_v1 = vpack.c.bf16 %v133_v0, %v132_v63 }
  0x9f   :  { %217 = vmatmul.bf16.gmra.mxu0 %v135_v1  ;;  %496 = vmatpush.bf16.msra.mxu3 %v1119_v51 }
  0xa0   :  { %587 = vmatpush.bf16.msrb.mxu0 %v1131_v60 }
  0xa3   :  { %1151 = vmatpush.bf16.msrb.mxu3 %v1134_v52 }
  0xa7   :  { %1152 = vmatpush.bf16.msrb.mxu3 %v1133_v54  ;;  %v1145_v54 = vld [vmem:[#allocation2 + $0x190] sm:$0xff] }
  0xab   :  { %1153 = vmatpush.bf16.msrb.mxu3 %v1132_v56  ;;  %v1143_v56 = vld [vmem:[#allocation2 + $0x180] sm:$0xff] }
  0xaf   :  { %1154 = vmatpush.bf16.msrb.mxu3 %v1131_v60 }
 0x10c   :  { %v213_v7 = vpop.f32.mrf.mxu0 }
 0x10d   :  { %v214_v11 = vadd.f32 %v1175_v9, %v213_v7  ;;  %v1130_v7 = vld [vmem:[#allocation2 + $0x118] sm:$0xff] }
 0x10e   :  { %588 = vmatpush.bf16.msrb.mxu0 %v1130_v7  ;;  %1155 = vmatpush.bf16.msrb.mxu3 %v1130_v7 }
 0x10f   :  { %v223_v15 = vmax.f32 %v214_v11, 0.0  ;;  %v1142_v11 = vld [vmem:[#allocation2 + $0x178] sm:$0xff] }
 0x110   :  { %679 = vmatpush.bf16.msrb.mxu1 %v1142_v11 }
 0x112   :  { %589 = vmatpush.bf16.msrb.mxu0 %v1129_v8  ;;  %1156 = vmatpush.bf16.msrb.mxu3 %v1129_v8  ;;  %v1181_v8 = vld [vmem:[%s1331_s4 + $0x6] ss:$0 sm:$0xff] }
 0x114   :  { %v215_v12 = vpop.f32.mrf.mxu0 }
 0x115   :  { %v216_v13 = vadd.f32 %v1175_v9, %v215_v12 }
 0x117   :  { %v224_v16 = vmax.f32 %v216_v13, 0.0  ;;  %v1141_v13 = vld [vmem:[#allocation2 + $0x170] sm:$0xff] }
 0x118   :  { %680 = vmatpush.bf16.msrb.mxu1 %v1141_v13 }
 0x119   :  { %v227_v17 = vpack.c.bf16 %v224_v16, %v223_v15  ;;  %v1140_v15 = vld [vmem:[#allocation2 + $0x168] sm:$0xff] }
 0x11b   :  { %307 = vmatmul.bf16.vlgmr.msra.gmra.mxu1 %v227_v17 }
 0x11c   :  { %v218_v18 = vpop.f32.mrf.mxu0  ;;  %681 = vmatpush.bf16.msrb.mxu1 %v1140_v15 }
 0x11d   :  { %v219_v19 = vadd.f32 %v1175_v9, %v218_v18 }
 0x11f   :  { %v225_v22 = vmax.f32 %v219_v19, 0.0  ;;  %v1139_v19 = vld [vmem:[#allocation2 + $0x160] sm:$0xff] }
 0x120   :  { %682 = vmatpush.bf16.msrb.mxu1 %v1139_v19 }
 0x124   :  { %v220_v20 = vpop.f32.mrf.mxu0 }
 0x125   :  { %v221_v21 = vadd.f32 %v1175_v9, %v220_v20  ;;  %v1128_v9 = vld [vmem:[#allocation2 + $0x108] sm:$0xff] }
 0x126   :  { %590 = vmatpush.bf16.msrb.mxu0 %v1128_v9  ;;  %1157 = vmatpush.bf16.msrb.mxu3 %v1128_v9  ;;  %v797_v9 = vld [vmem:[%s1332_s5] sm:$0x7] }
 0x127   :  { %v226_v23 = vmax.f32 %v221_v21, 0.0  ;;  %v798_v13 = vperm.slane %v797_v9, 0  ;;  %v811_v19 = vperm.slane %v797_v9, 1 }
 0x129   :  { %v228_v24 = vpack.c.bf16 %v226_v23, %v225_v22 }
 0x12a   :  { %591 = vmatpush.bf16.msrb.mxu0 %v1127_v10  ;;  %1158 = vmatpush.bf16.msrb.mxu3 %v1127_v10 }
 0x12b   :  { %312 = vmatmul.bf16.gmra.mxu1 %v228_v24 }
 0x198   :  { %v308_v30 = vpop.f32.mrf.mxu1 }
 0x199   :  { %v309_v34 = vadd.f32 %v1176_v32, %v308_v30  ;;  %v1138_v30 = vld [vmem:[#allocation2 + $0x158] sm:$0xff] }
 0x19a   :  { %683 = vmatpush.bf16.msrb.mxu1 %v1138_v30 }
 0x19b   :  { %v318_v38 = vmax.f32 %v309_v34, 0.0 }
 0x19e   :  { %684 = vmatpush.bf16.msrb.mxu1 %v1137_v31 }
 0x1a0   :  { %v310_v35 = vpop.f32.mrf.mxu1 }
 0x1a1   :  { %v311_v36 = vadd.f32 %v1176_v32, %v310_v35  ;;  %v1179_v35 = vld [vmem:[%s1331_s4 + $0x4] ss:$0 sm:$0xff] }
 0x1a3   :  { %v319_v39 = vmax.f32 %v311_v36, 0.0  ;;  %v1150_v36 = vld [vmem:[#allocation2 + $0x1b8] sm:$0xff] }
 0x1a4   :  { %774 = vmatpush.bf16.msrb.mxu2 %v1150_v36 }
 0x1a5   :  { %v322_v40 = vpack.c.bf16 %v319_v39, %v318_v38  ;;  %v1149_v38 = vld [vmem:[#allocation2 + $0x1b0] sm:$0xff] }
 0x1a7   :  { %402 = vmatmul.bf16.vlgmr.msra.gmra.mxu2 %v322_v40 }
 0x1a8   :  { %v313_v41 = vpop.f32.mrf.mxu1  ;;  %775 = vmatpush.bf16.msrb.mxu2 %v1149_v38 }
 0x1a9   :  { %v314_v42 = vadd.f32 %v1176_v32, %v313_v41 }
 0x1ab   :  { %v320_v45 = vmax.f32 %v314_v42, 0.0 }
 0x1b0   :  { %v315_v43 = vpop.f32.mrf.mxu1 }
 0x1b1   :  { %v316_v44 = vadd.f32 %v1176_v32, %v315_v43  ;;  %v1136_v32 = vld [vmem:[#allocation2 + $0x148] sm:$0xff] }
 0x1b2   :  { %685 = vmatpush.bf16.msrb.mxu1 %v1136_v32  ;;  %v1148_v43 = vld [vmem:[#allocation2 + $0x1a8] sm:$0xff] }
 0x1b3   :  { %v321_v46 = vmax.f32 %v316_v44, 0.0  ;;  %776 = vmatpush.bf16.msrb.mxu2 %v1148_v43 }
 0x1b5   :  { %v323_v47 = vpack.c.bf16 %v321_v46, %v320_v45  ;;  %v1147_v45 = vld [vmem:[#allocation2 + $0x1a0] sm:$0xff] }
 0x1b6   :  { %686 = vmatpush.bf16.msrb.mxu1 %v1135_v33 }
 0x1b7   :  { %407 = vmatmul.bf16.gmra.mxu2 %v323_v47 }
 0x1b8   :  { %777 = vmatpush.bf16.msrb.mxu2 %v1147_v45 }
 0x22a   :  { %v403_v53 = vpop.f32.mrf.mxu2 }
 0x22b   :  { %v404_v57 = vadd.f32 %v1177_v55, %v403_v53  ;;  %v1146_v53 = vld [vmem:[#allocation2 + $0x198] sm:$0xff] }
 0x22c   :  { %778 = vmatpush.bf16.msrb.mxu2 %v1146_v53 }
 0x22d   :  { %v413_v61 = vmax.f32 %v404_v57, 0.0 }
 0x230   :  { %779 = vmatpush.bf16.msrb.mxu2 %v1145_v54 }
 0x232   :  { %v405_v58 = vpop.f32.mrf.mxu2 }
 0x233   :  { %v406_v59 = vadd.f32 %v1177_v55, %v405_v58  ;;  %v1180_v58 = vld [vmem:[%s1331_s4 + $0x5] ss:$0 sm:$0xff] }
 0x235   :  { %v414_v62 = vmax.f32 %v406_v59, 0.0 }
 0x237   :  { %v417_v63 = vpack.c.bf16 %v414_v62, %v413_v61 }
 0x239   :  { %497 = vmatmul.bf16.vlgmr.msra.gmra.mxu3 %v417_v63 }
 0x23a   :  { %v408_v0 = vpop.f32.mrf.mxu2 }
 0x23b   :  { %v409_v1 = vadd.f32 %v1177_v55, %v408_v0 }
 0x23d   :  { %v415_v4 = vmax.f32 %v409_v1, 0.0 }
 0x242   :  { %v410_v2 = vpop.f32.mrf.mxu2 }
 0x243   :  { %v411_v3 = vadd.f32 %v1177_v55, %v410_v2  ;;  %v1144_v55 = vld [vmem:[#allocation2 + $0x188] sm:$0xff] }
 0x244   :  { %780 = vmatpush.bf16.msrb.mxu2 %v1144_v55 }
 0x245   :  { %v416_v5 = vmax.f32 %v411_v3, 0.0 }
 0x247   :  { %v418_v6 = vpack.c.bf16 %v416_v5, %v415_v4 }
 0x248   :  { %781 = vmatpush.bf16.msrb.mxu2 %v1143_v56 }
 0x249   :  { %502 = vmatmul.bf16.gmra.mxu3 %v418_v6 }
 0x2bc   :  { %v498_v12 = vpop.f32.mrf.mxu3 }
 0x2bd   :  { %v499_v16 = vadd.f32 %v1178_v14, %v498_v12  ;;  %v824_v12 = vperm.slane %v797_v9, 2 }
 0x2bf   :  { %v508_v20 = vmax.f32 %v499_v16, 0.0 }
 0x2c4   :  { %v500_v17 = vpop.f32.mrf.mxu3 }
 0x2c5   :  { %v501_v18 = vadd.f32 %v1178_v14, %v500_v17 }
 0x2c7   :  { %v509_v21 = vmax.f32 %v501_v18, 0.0 }
 0x2c9   :  { %v512_v22 = vpack.c.bf16 %v509_v21, %v508_v20 }
 0x2cb   :  { %592 = vmatmul.bf16.vlgmr.msrb.gmra.mxu0 %v512_v22 }
 0x2cc   :  { %v503_v23 = vpop.f32.mrf.mxu3 }
 0x2cd   :  { %v504_v24 = vadd.f32 %v1178_v14, %v503_v23 }
 0x2cf   :  { %v510_v27 = vmax.f32 %v504_v24, 0.0 }
 0x2d4   :  { %v505_v25 = vpop.f32.mrf.mxu3 }
 0x2d5   :  { %v506_v26 = vadd.f32 %v1178_v14, %v505_v25 }
 0x2d7   :  { %v511_v28 = vmax.f32 %v506_v26, 0.0 }
 0x2d9   :  { %v513_v29 = vpack.c.bf16 %v511_v28, %v510_v27 }
 0x2db   :  { %597 = vmatmul.bf16.vlgmr.msrb.gmra.mxu3 %v513_v29 }
 0x348   :  { %v593_v34 = vpop.f32.mrf.mxu0 }
 0x349   :  { %v594_v37 = vadd.f32 %v1179_v35, %v593_v34 }
 0x34b   :  { %v603_v41 = vmax.f32 %v594_v37, 0.0 }
 0x350   :  { %v595_v39 = vpop.f32.mrf.mxu0 }
 0x351   :  { %v596_v40 = vadd.f32 %v1179_v35, %v595_v39  ;;  %v1182_v39 = vld [vmem:[%s1333_s6] ss:$0 sm:$0xff] }
 0x353   :  { %v604_v42 = vmax.f32 %v596_v40, 0.0 }
 0x355   :  { %v607_v44 = vpack.c.bf16 %v604_v42, %v603_v41 }
 0x357   :  { %687 = vmatmul.bf16.vlgmr.msrb.gmra.mxu1 %v607_v44 }
 0x35e   :  { %v598_v46 = vpop.f32.mrf.mxu3 }
 0x35f   :  { %v599_v47 = vadd.f32 %v1179_v35, %v598_v46 }
 0x361   :  { %v605_v50 = vmax.f32 %v599_v47, 0.0 }
 0x366   :  { %v600_v48 = vpop.f32.mrf.mxu3 }
 0x367   :  { %v601_v49 = vadd.f32 %v1179_v35, %v600_v48 }
 0x369   :  { %v606_v51 = vmax.f32 %v601_v49, 0.0 }
 0x36b   :  { %v608_v52 = vpack.c.bf16 %v606_v51, %v605_v50 }
 0x36d   :  { %692 = vmatmul.bf16.gmra.mxu1 %v608_v52 }
 0x3d4   :  { %v688_v57 = vpop.f32.mrf.mxu1 }
 0x3d5   :  { %v689_v59 = vadd.f32 %v1180_v58, %v688_v57 }
 0x3d7   :  { %v698_v62 = vmax.f32 %v689_v59, 0.0 }
 0x3dc   :  { %v690_v60 = vpop.f32.mrf.mxu1 }
 0x3dd   :  { %v691_v61 = vadd.f32 %v1180_v58, %v690_v60 }
 0x3df   :  { %v699_v63 = vmax.f32 %v691_v61, 0.0 }
 0x3e1   :  { %v702_v0 = vpack.c.bf16 %v699_v63, %v698_v62 }
 0x3e3   :  { %782 = vmatmul.bf16.vlgmr.msrb.gmra.mxu2 %v702_v0 }
 0x3ea   :  { %v693_v1 = vpop.f32.mrf.mxu1 }
 0x3eb   :  { %v694_v2 = vadd.f32 %v1180_v58, %v693_v1 }
 0x3ed   :  { %v700_v5 = vmax.f32 %v694_v2, 0.0 }
 0x3f2   :  { %v695_v3 = vpop.f32.mrf.mxu1 }
 0x3f3   :  { %v696_v4 = vadd.f32 %v1180_v58, %v695_v3 }
 0x3f5   :  { %v701_v6 = vmax.f32 %v696_v4, 0.0 }
 0x3f7   :  { %v703_v7 = vpack.c.bf16 %v701_v6, %v700_v5 }
 0x3f9   :  { %787 = vmatmul.bf16.gmra.mxu2 %v703_v7 }
 0x466   :  { %v783_v10 = vpop.f32.mrf.mxu2 }
 0x467   :  { %v784_v11 = vadd.f32 %v1181_v8, %v783_v10 }
 0x469   :  { %v793_v14 = vmax.f32 %v784_v11, 0.0 }
 0x46b   :  { %v825_v15 = vmul.f32 %v824_v12, %v793_v14  ;;  %v799_v16 = vmul.f32 %v798_v13, %v793_v14  ;;  %v812_v22 = vmul.f32 %v811_v19, %v793_v14 }
 0x46d   :  { %829 = vadd.xlane.f32.xlu2 %v825_v15  ;;  %803 = vadd.xlane.f32.xlu1 %v799_v16 }
 0x46e   :  { %v785_v17 = vpop.f32.mrf.mxu2 }
 0x46f   :  { %v786_v18 = vadd.f32 %v1181_v8, %v785_v17 }
 0x471   :  { %v794_v20 = vmax.f32 %v786_v18, 0.0 }
 0x473   :  { %v800_v21 = vmul.f32 %v798_v13, %v794_v20  ;;  %v813_v23 = vmul.f32 %v811_v19, %v794_v20  ;;  %v826_v36 = vmul.f32 %v824_v12, %v794_v20 }
 0x475   :  { %805 = vadd.xlane.f32.xlu2 %v800_v21  ;;  %816 = vadd.xlane.f32.xlu1 %v812_v22 }
 0x47c   :  { %v788_v24 = vpop.f32.mrf.mxu2 }
 0x47d   :  { %v789_v25 = vadd.f32 %v1181_v8, %v788_v24  ;;  %818 = vadd.xlane.f32.xlu2 %v813_v23 }
 0x47f   :  { %v795_v26 = vmax.f32 %v789_v25, 0.0 }
 0x481   :  { %v801_v27 = vmul.f32 %v798_v13, %v795_v26  ;;  %v814_v33 = vmul.f32 %v811_v19, %v795_v26  ;;  %v827_v35 = vmul.f32 %v824_v12, %v795_v26 }
 0x483   :  { %807 = vadd.xlane.f32.xlu0 %v801_v27 }
 0x484   :  { %v790_v28 = vpop.f32.mrf.mxu2 }
 0x485   :  { %v791_v29 = vadd.f32 %v1181_v8, %v790_v28 }
 0x487   :  { %v796_v30 = vmax.f32 %v791_v29, 0.0 }
 0x489   :  { %v815_v31 = vmul.f32 %v811_v19, %v796_v30  ;;  %v802_v32 = vmul.f32 %v798_v13, %v796_v30  ;;  %v828_v34 = vmul.f32 %v824_v12, %v796_v30 }
 0x48b   :  { %822 = vadd.xlane.f32.xlu1 %v815_v31  ;;  %809 = vadd.xlane.f32.xlu2 %v802_v32 }
 0x48c   :  { %820 = vadd.xlane.f32.xlu0 %v814_v33 }
 0x493   :  { %835 = vadd.xlane.f32.xlu2 %v828_v34  ;;  %833 = vadd.xlane.f32.xlu1 %v827_v35 }
 0x494   :  { %831 = vadd.xlane.f32.xlu0 %v826_v36 }
 0x4e0   :  { %v804_v37 = vpop.xlane.xlu1 %803  ;;  %v830_v38 = vpop.xlane.xlu2 %829 }
 0x4e8   :  { %v817_v40 = vpop.xlane.xlu1 %816  ;;  %v806_v44 = vpop.xlane.xlu2 %805 }
 0x4e9   :  { %v838_v41 = vsel %vm837_vm0, %v804_v37, %v817_v40 }
 0x4ea   :  { %v843_v42 = vsel %vm842_vm1, %v838_v41, %v830_v38 }
 0x4eb   :  { %v851_v43 = vadd.f32 %v1182_v39, %v843_v42 }
 0x4ed   :  { %856 = vst.msk [vmem:[%s1334_s7] sm:$0xff] %vm855_vm2, %v851_v43 }
 0x4f0   :  { %v819_v45 = vpop.xlane.xlu2 %818 }
 0x4f1   :  { %v839_v54 = vsel %vm837_vm0, %v806_v44, %v819_v45 }
 0x4f6   :  { %v808_v46 = vpop.xlane.xlu0 %807 }
 0x4fe   :  { %v823_v47 = vpop.xlane.xlu1 %822  ;;  %v810_v48 = vpop.xlane.xlu2 %809 }
 0x4ff   :  { %v821_v49 = vpop.xlane.xlu0 %820  ;;  %v841_v50 = vsel %vm837_vm0, %v810_v48, %v823_v47 }
 0x500   :  { %v840_v51 = vsel %vm837_vm0, %v808_v46, %v821_v49 }
 0x506   :  { %v836_v52 = vpop.xlane.xlu2 %835  ;;  %v834_v53 = vpop.xlane.xlu1 %833 }
 0x507   :  { %v846_v55 = vsel %vm842_vm1, %v841_v50, %v836_v52  ;;  %v845_v56 = vsel %vm842_vm1, %v840_v51, %v834_v53  ;;  %v832_v57 = vpop.xlane.xlu0 %831 }
 0x508   :  { %v854_v58 = vadd.f32 %v1182_v39, %v846_v55  ;;  %v853_v59 = vadd.f32 %v1182_v39, %v845_v56  ;;  %v844_v60 = vsel %vm842_vm1, %v839_v54, %v832_v57 }
 0x509   :  { %v852_v61 = vadd.f32 %v1182_v39, %v844_v60 }
 0x50a   :  { %859 = vst.msk [vmem:[%s1334_s7 + $0x18] sm:$0xff] %vm855_vm2, %v854_v58 }
 0x50b   :  { %858 = vst.msk [vmem:[%s1334_s7 + $0x10] sm:$0xff] %vm855_vm2, %v853_v59 }
 0x50c   :  { %857 = vst.msk [vmem:[%s1334_s7 + $0x8] sm:$0xff] %vm855_vm2, %v852_v61 }
 0x50d   :  { %864 = vsyncpa [#allocation3], 1 }

</bundles_post_ra>
